<compile_context>
chip_gen: v6e
topology: v6e:2x2x1
jax: 0.10.0
libtpu: 0.0.40
codegen_flags: <defaults>
</compile_context>

<pallas_src>
import jax
import jax.numpy as jnp
from jax import lax
from jax.experimental import pallas as pl
from jax.experimental.pallas import tpu as pltpu


def _round_up(n, m):
    return (n + m - 1) // m * m


def _pick_batch_tile(B, tm_desired):
    """Large batch tile (amortize per-step pipeline overhead) but:
       - keep >= 2 grid steps when the batch allows (v7x megacore),
       - multiple of 8 (sublane alignment),
       - multiple of 256 when large so the in-kernel sub-tile loop divides it."""
    B8 = _round_up(max(B, 1), 8)
    if B8 >= 16:
        cap = max(8, (B8 // 2) // 8 * 8)   # at least 2 grid steps
    else:
        cap = B8
    tm = max(8, (min(tm_desired, cap) // 8) * 8)
    if tm > 512:
        tm = max(512, (tm // 256) * 256)
    return tm


def _make_mlp_head_kernel(tsub, n_sub):
    """Kernel factory: fused Linear->ReLU->(Dropout=id)->Linear over one batch tile,
    processed in `n_sub` sub-tiles of `tsub` rows each."""

    def kernel(x_ref, w1_ref, b1_ref, w2_ref, b2_ref, o_ref):
        # x:  [tm, D]  (producer dtype, cast to bf16 in-kernel)
        # w1: [D, H] bf16   b1: [1, H]  f32
        # w2: [H, Cp] bf16  b2: [1, Cp] f32
        # o:  [tm, Cp] f32  (Cp = class dim padded to 128 lanes)
        b1 = b1_ref[...]
        b2 = b2_ref[...]

        def sub_tile(r0):
            x = x_ref[pl.ds(r0, tsub), :].astype(jnp.bfloat16)
            # First linear on the MXU (bf16 operands, f32 accumulate), bias+ReLU in f32.
            h = jnp.dot(x, w1_ref[...], preferred_element_type=jnp.float32)
            h = jnp.maximum(h + b1, 0.0)
            # Dropout(0.5): identity at inference time.
            # Second linear on the MXU (lane-dense padded class dim), bias in f32.
            out = jnp.dot(h.astype(jnp.bfloat16), w2_ref[...],
                          preferred_element_type=jnp.float32)
            o_ref[pl.ds(r0, tsub), :] = out + b2

        if n_sub == 1:
            sub_tile(0)
        else:
            def body(s, carry):
                sub_tile(pl.multiple_of(s * tsub, tsub))
                return carry
            lax.fori_loop(0, n_sub, body, 0, unroll=True)

    return kernel


def prepare_head_params(w1, b1, w2, b2):
    """One-time parameter prep (hoisted out of the forward path, cache the result):
       cast weights to bf16, lane-pad the class dim to a multiple of 128."""
    _, H = w1.shape
    C = w2.shape[1]
    C_pad = _round_up(C, 128)
    w1_b = w1.astype(jnp.bfloat16)
    b1_2d = b1.reshape(1, H).astype(jnp.float32)
    w2_p = jnp.pad(w2, ((0, 0), (0, C_pad - C))).astype(jnp.bfloat16)   # zero cols
    b2_2d = jnp.pad(b2, (0, C_pad - C)).reshape(1, C_pad).astype(jnp.float32)
    return (w1_b, b1_2d, w2_p, b2_2d, C)


def complex_classifier_head(x, params, *, tm=1024):
    """Fused forward pass of ComplexClassifierHead (eval mode).

    x: [B, D] (f32 or bf16)  params: output of prepare_head_params()
    returns [B, C] float32
    """
    w1_b, b1_2d, w2_p, b2_2d, C = params
    B, D = x.shape
    H = w1_b.shape[1]
    C_pad = w2_p.shape[1]

    tm = _pick_batch_tile(B, tm)
    B_pad = _round_up(B, tm)
    # Pad the batch only when needed (avoids an extra HBM pass over x).
    x_in = x if B_pad == B else jnp.pad(x, ((0, B_pad - B), (0, 0)))

    # In-kernel sub-tiling of the batch tile (bounds f32 intermediates on v5e).
    if tm > 256 and tm % 256 == 0:
        tsub, n_sub = 256, tm // 256
    else:
        tsub, n_sub = tm, 1

    grid = (B_pad // tm,)

    flops = 2 * B_pad * (D * H + H * C_pad)
    bytes_accessed = (x_in.size * x_in.dtype.itemsize
                      + w1_b.size * 2 + w2_p.size * 2
                      + b1_2d.size * 4 + b2_2d.size * 4
                      + B_pad * C_pad * 4)

    out = pl.pallas_call(
        _make_mlp_head_kernel(tsub, n_sub),
        out_shape=jax.ShapeDtypeStruct((B_pad, C_pad), jnp.float32),
        grid_spec=pltpu.PrefetchScalarGridSpec(
            num_scalar_prefetch=0,
            grid=grid,
            in_specs=[
                pl.BlockSpec((tm, D), lambda i: (i, 0)),      # activations: tiled over B
                pl.BlockSpec((D, H), lambda i: (0, 0)),       # w1: VMEM-resident
                pl.BlockSpec((1, H), lambda i: (0, 0)),       # b1: VMEM-resident
                pl.BlockSpec((H, C_pad), lambda i: (0, 0)),   # w2: VMEM-resident
                pl.BlockSpec((1, C_pad), lambda i: (0, 0)),   # b2: VMEM-resident
            ],
            out_specs=pl.BlockSpec((tm, C_pad), lambda i: (i, 0)),
        ),
        compiler_params=pltpu.CompilerParams(
            dimension_semantics=("parallel",),
            vmem_limit_bytes=32 * 1024 * 1024,   # fits tm<=2048 f32 x tiles; safe on v7x
        ),
        cost_estimate=pl.CostEstimate(
            flops=flops, transcendentals=0, bytes_accessed=bytes_accessed),
    )(x_in, w1_b, b1_2d, w2_p, b2_2d)

    # Strip batch padding and the zeroed class-padding columns.
    return out[:B, :C]


def _init_params(key, input_dim, hidden, num_classes):
    """Deterministic init mimicking nn.Linear defaults (uniform +/- 1/sqrt(fan_in))."""
    k1, k2, k3, k4 = jax.random.split(key, 4)
    lim1 = 1.0 / jnp.sqrt(input_dim)
    lim2 = 1.0 / jnp.sqrt(hidden)
    w1 = jax.random.uniform(k1, (input_dim, hidden), jnp.float32, -lim1, lim1)
    b1 = jax.random.uniform(k2, (hidden,), jnp.float32, -lim1, lim1)
    w2 = jax.random.uniform(k3, (hidden, num_classes), jnp.float32, -lim2, lim2)
    b2 = jax.random.uniform(k4, (num_classes,), jnp.float32, -lim2, lim2)
    return w1, b1, w2, b2


if __name__ == "__main__":
    # Module defaults: input_dim = DINO_FEATURE_DIMENSIONS = 768, hidden fixed at 256.
    # Small batch chosen so the grid still has 2 steps (tile-selection exercised).
    B, INPUT_DIM, HIDDEN, NUM_CLASSES = 32, 768, 256, 10

    key = jax.random.PRNGKey(0)
    kx, kp = jax.random.split(key)
    x = jax.random.normal(kx, (B, INPUT_DIM), jnp.float32)
    w1, b1, w2, b2 = _init_params(kp, INPUT_DIM, HIDDEN, NUM_CLASSES)

    # One-time parameter prep (hoisted out of the per-call path).
    params = prepare_head_params(w1, b1, w2, b2)

    out = complex_classifier_head(x, params)
    out = jax.block_until_ready(out)

    # Pure-JAX f32 reference (eval-mode dropout = identity). Tolerance loosened
    # because the kernel uses bf16 MXU operands with f32 accumulation.
    h_ref = jnp.maximum(x @ w1 + b1, 0.0)
    ref = h_ref @ w2 + b2

    assert out.shape == (B, NUM_CLASSES)
    assert jnp.allclose(out, ref, atol=5e-2, rtol=5e-2), "mismatch vs reference"
    print("KERNEL_OK")
</pallas_src>

<mosaic_0001>
module attributes {stable_mosaic.version = 11 : i64} {
  func.func @kernel(%arg0: i32, %arg1: memref<16x768xf32, #tpu.memory_space<vmem>>, %arg2: memref<768x256xbf16, #tpu.memory_space<vmem>>, %arg3: memref<1x256xf32, #tpu.memory_space<vmem>>, %arg4: memref<256x128xbf16, #tpu.memory_space<vmem>>, %arg5: memref<1x128xf32, #tpu.memory_space<vmem>>, %arg6: memref<16x128xf32, #tpu.memory_space<vmem>>) attributes {dimension_semantics = [#tpu.dimension_semantics<parallel>], iteration_bounds = array<i64: 2>, scalar_prefetch = 0 : i64, scratch_operands = 0 : i64, tpu.core_type = #tpu.core_type<tc>, window_params = [{transform_indices = @transform_0, window_bounds = array<i64: 16, 768>}, {pipeline_mode = #tpu.pipeline_mode<synchronous>, transform_indices = @transform_1, window_bounds = array<i64: 768, 256>}, {pipeline_mode = #tpu.pipeline_mode<synchronous>, transform_indices = @transform_2, window_bounds = array<i64: 1, 256>}, {pipeline_mode = #tpu.pipeline_mode<synchronous>, transform_indices = @transform_3, window_bounds = array<i64: 256, 128>}, {pipeline_mode = #tpu.pipeline_mode<synchronous>, transform_indices = @transform_4, window_bounds = array<i64: 1, 128>}, {transform_indices = @transform_5, window_bounds = array<i64: 16, 128>}]} {
    %c0 = arith.constant 0 : index
    %c0_0 = arith.constant 0 : index
    %0 = vector.load %arg3[%c0, %c0_0] : memref<1x256xf32, #tpu.memory_space<vmem>>, vector<1x256xf32>
    %c0_1 = arith.constant 0 : index
    %c0_2 = arith.constant 0 : index
    %1 = vector.load %arg5[%c0_1, %c0_2] : memref<1x128xf32, #tpu.memory_space<vmem>>, vector<1x128xf32>
    %c0_3 = arith.constant 0 : index
    %c0_4 = arith.constant 0 : index
    %2 = vector.load %arg1[%c0_3, %c0_4] : memref<16x768xf32, #tpu.memory_space<vmem>>, vector<16x768xf32>
    %3 = arith.truncf %2 : vector<16x768xf32> to vector<16x768xbf16>
    %c0_5 = arith.constant 0 : index
    %c0_6 = arith.constant 0 : index
    %4 = vector.load %arg2[%c0_5, %c0_6] : memref<768x256xbf16, #tpu.memory_space<vmem>>, vector<768x256xbf16>
    %cst = arith.constant dense<0.000000e+00> : vector<16x256xf32>
    %5 = tpu.matmul %3, %4, %cst {dimension_numbers = #tpu.dot_dimension_numbers<[1], [0], [0], [1], [0, 0, 1, 1], [], []>} : vector<16x768xbf16>, vector<768x256xbf16>, vector<16x256xf32> -> vector<16x256xf32>
    %6 = vector.broadcast %0 : vector<1x256xf32> to vector<16x256xf32>
    %7 = arith.addf %5, %6 : vector<16x256xf32>
    %cst_7 = arith.constant 0.000000e+00 : f32
    %8 = vector.broadcast %cst_7 : f32 to vector<16x256xf32>
    %9 = arith.maximumf %7, %8 : vector<16x256xf32>
    %10 = arith.truncf %9 : vector<16x256xf32> to vector<16x256xbf16>
    %c0_8 = arith.constant 0 : index
    %c0_9 = arith.constant 0 : index
    %11 = vector.load %arg4[%c0_8, %c0_9] : memref<256x128xbf16, #tpu.memory_space<vmem>>, vector<256x128xbf16>
    %cst_10 = arith.constant dense<0.000000e+00> : vector<16x128xf32>
    %12 = tpu.matmul %10, %11, %cst_10 {dimension_numbers = #tpu.dot_dimension_numbers<[1], [0], [0], [1], [0, 0, 1, 1], [], []>} : vector<16x256xbf16>, vector<256x128xbf16>, vector<16x128xf32> -> vector<16x128xf32>
    %13 = vector.broadcast %1 : vector<1x128xf32> to vector<16x128xf32>
    %14 = arith.addf %12, %13 : vector<16x128xf32>
    %c0_11 = arith.constant 0 : index
    %c0_12 = arith.constant 0 : index
    %15 = vector.load %arg6[%c0_11, %c0_12] : memref<16x128xf32, #tpu.memory_space<vmem>>, vector<16x128xf32>
    tpu.vector_store %arg6[%c0_11, %c0_12], %14 {strides = array<i32>} : memref<16x128xf32, #tpu.memory_space<vmem>>, vector<16x128xf32>,
    return
  }
  func.func @transform_0(%arg0: i32) -> (i32, i32) {
    %c0_i32 = arith.constant 0 : i32
    %c0_i32_0 = arith.constant 0 : i32
    return %arg0, %c0_i32 : i32, i32
  }
  func.func @transform_1(%arg0: i32) -> (i32, i32) {
    %c0_i32 = arith.constant 0 : i32
    %c0_i32_0 = arith.constant 0 : i32
    %c0_i32_1 = arith.constant 0 : i32
    return %c0_i32, %c0_i32_0 : i32, i32
  }
  func.func @transform_2(%arg0: i32) -> (i32, i32) {
    %c0_i32 = arith.constant 0 : i32
    %c0_i32_0 = arith.constant 0 : i32
    %c0_i32_1 = arith.constant 0 : i32
    return %c0_i32, %c0_i32_0 : i32, i32
  }
  func.func @transform_3(%arg0: i32) -> (i32, i32) {
    %c0_i32 = arith.constant 0 : i32
    %c0_i32_0 = arith.constant 0 : i32
    %c0_i32_1 = arith.constant 0 : i32
    return %c0_i32, %c0_i32_0 : i32, i32
  }
  func.func @transform_4(%arg0: i32) -> (i32, i32) {
    %c0_i32 = arith.constant 0 : i32
    %c0_i32_0 = arith.constant 0 : i32
    %c0_i32_1 = arith.constant 0 : i32
    return %c0_i32, %c0_i32_0 : i32, i32
  }
  func.func @transform_5(%arg0: i32) -> (i32, i32) {
    %c0_i32 = arith.constant 0 : i32
    %c0_i32_0 = arith.constant 0 : i32
    return %arg0, %c0_i32 : i32, i32
  }
}

</mosaic_0001>

<bundles_post_ra>
// kernel: tpu_custom_call.1
= control target key start
LH: loop header
LB: loop body
LE: loop exit
PB: predicated region body
PF: predicated region fallthrough
CT: control target
= control target key end

     0   :  { %10 = vsyncpa [#allocation3], 0  ;;  %s2093_s0 = inlined_call_operand.hbm [shape: f32[32,768], index: 0, kind: input, shape index: {}]   ;;  %s2094_s1 = inlined_call_operand.hbm [shape: bf16[768,256], index: 1, kind: input, shape index: {}]   ;;  %s2095_s2 = inlined_call_operand.vmem [shape: f32[1,256], index: 2, kind: input, shape index: {}]   ;;  %s2096_s3 = inlined_call_operand.hbm [shape: bf16[256,128], index: 3, kind: input, shape index: {}]   ;;  %s2097_s4 = inlined_call_operand.vmem [shape: f32[1,128], index: 4, kind: input, shape index: {}]   ;;  %s2098_s5 = inlined_call_operand.hbm [shape: f32[32,128], index: 5, kind: output, shape index: {}]  }
   0x1   :  { %12 = vsyncpa [#allocation3 + $0x1], 0 }
   0x2   :  { %13 = vsyncpa [#allocation6], 0 }
   0x3   :  { %14 = vsyncpa [#allocation4], 0 }
   0x4   :  { %16 = vsyncpa [#allocation4 + $0x1], 0  ;;  %s1884_s18 = smov 0   ;;  %s1886_s19 = smov 0  }
   0x5   :  { %s1888_s20 = smov 0   ;;  %s1890_s21 = smov 0  }
   0x6 LB: > { %s1905_s22 = sadd.s32 4294967295, %s1840_s21   ;;  %s1301_s23 = sadd.s32 4294967294, %s1840_s21   ;;  %s1840_s21 = sphi %s1890_s21, %s2120_s21   ;;  %s1836_s20 = sphi %s1888_s20, %s2119_s20   ;;  %s1832_s19 = sphi %s1886_s19, %s2118_s19   ;;  %s1828_s18 = sphi %s1884_s18, %s2117_s18  }
   0x7   : > { %p42_p0 = scmp.ne.s32.totalorder %s1832_s19, %s1828_s18  ;;  %p2099_p1 = scmp.eq.s32.totalorder %s1905_s22, 0 }
   0x8   : > { %p156_p3 = scmp.eq.s32.totalorder %s1301_s23, 1  ;;  %p1302_p5 = scmp.ge.s32.totalorder %s1840_s21, 1 }
   0x9   : > { %p1914_p4 = por %p2099_p1, %p42_p0  ;;  %p163_p7 = scmp.lt.s32.totalorder %s1840_s21, 3 }
   0xa   : > { %p1919_p6 = por %p156_p3, %p42_p0  ;;  %s1842_s27 = smov [#allocation5]  }
   0xb   : > { %s2103_s24 = scalar_select %p1914_p4, 1, 0 }
   0xc   : > { %s2104_s25 = scalar_select %p1919_p6, 1, 0 }
   0xd   : > { %p1924_p8 = pnand %p1302_p5, %p163_p7  ;;  %s175_s28 = sshll.u32 %s1842_s27, 4  ;;  %s176_s28 = int_to_ptr.vmem [resolvable:$true] %s175_s28 }
   0xe   : > { %s1843_s30 = smov [#allocation7]   ;;  %s1703_s7 = scalar_lea.vmem %s176_s28, 12288 }
   0xf   : > { %s2105_s26 = scalar_select %p1924_p8, 1, 0 }
  0x10   : > { %p1469_p9 = pneg %p1924_p8  ;;  %s191_s6 = sshll.u32 %s1843_s30, 4  ;;  %s192_s6 = int_to_ptr.vmem [resolvable:$true] %s191_s6 }
  0x11   : > { %p1704_p13 = scmp.ne.s32.totalorder %s176_s28, %s1703_s7  ;;  %p1711_p5 = scmp.lt.s32.totalorder %s176_s28, %s176_s28 }
  0x12   : > { %p1933_p11 = pnand %p1469_p9, %p2099_p1  ;;  %p1712_p7 = scmp.lt.s32.totalorder %s1703_s7, %s1703_s7 }
  0x14   : > { %p1694_p12 = pneg %p1933_p11  ;;  %p1713_p10 = por %p1712_p7, %p1711_p5 }
  0x16   : > { %p1706_p0 = pnand %p1704_p13, %p1694_p12 }
  0x18   : > { %p1707_p3 = pneg %p1706_p0 }
  0x1a   : > { %p1714_p9 = pnand %p1713_p10, %p1707_p3 }
  0x1c   : > { %1717 = shalt.err (!%p1714_p9)
}
  0x1d   : > { %s1844_s8 = smov 128   ;;  %s1845_s9 = smov 8  }
  0x1e   : > { %1472 = dma.hbm_to_vmem [thread:$0]  (!%p1933_p11), %s2094_s1, 12288, %s176_s28, [#allocation6], %s1844_s8, %s1844_s8, %s1845_s9  }
  0x1f   : > { %s1729_s12 = scalar_lea.vmem %s192_s6, 2048  ;;  %p1737_p2 = scmp.lt.s32.totalorder %s192_s6, %s192_s6 }
  0x20   : > { %p1730_p1 = scmp.ne.s32.totalorder %s192_s6, %s1729_s12  ;;  %p1738_p6 = scmp.lt.s32.totalorder %s1729_s12, %s1729_s12 }
  0x22   : > { %p1732_p13 = pnand %p1730_p1, %p1694_p12  ;;  %p1739_p5 = por %p1738_p6, %p1737_p2 }
  0x24   : > { %p1733_p0 = pneg %p1732_p13 }
  0x26   : > { %p1740_p10 = pnand %p1739_p5, %p1733_p0 }
  0x28   : > { %1743 = shalt.err (!%p1740_p10)
}
  0x29   : > { %s1846_s13 = smov 64   ;;  %s1847_s14 = smov 4  }
  0x2a   : > { %1475 = dma.hbm_to_vmem [thread:$0]  (!%p1933_p11), %s2096_s3, 2048, %s192_s6, [#allocation6], %s1846_s13, %s1846_s13, %s1847_s14  }
  0x2b   : > { %s1956_s17 = sadd.s32 1, %s1840_s21   ;;  %s29_s27 = sadd.s32 1, %s1836_s20 }
  0x2c   : > { %s26_s23 = ssub.s32 %s1840_s21, %s1956_s17  ;;  %p36_p2 = scmp.ne.s32.totalorder %s1836_s20, %s1832_s19 }
  0x2d   : > { %p27_p1 = scmp.eq.s32.totalorder %s26_s23, 0  ;;  %p37_p6 = scmp.eq.s32.totalorder %s1840_s21, 0 }
  0x2e   : > { %p2107_p3 = scmp.eq.s32.totalorder %s1905_s22, 1  ;;  %p1486_p9 = scmp.lt.s32.totalorder %s1840_s21, 2 }
  0x2f   : > { %s1965_s28 = scalar_select %p27_p1, %s1836_s20, %s29_s27  }
  0x30   : > { %p38_p12 = por %p37_p6, %p36_p2  ;;  %p1969_p7 = por %p2107_p3, %p36_p2 }
  0x31   : > { %s208_s29 = sand.u32 1, %s1836_s20   ;;  %s1455_s6 = smul.u32 1536, %s1840_s21 }
  0x32   : > { %s2108_s30 = scalar_select %p1969_p7, 1, 0 }
  0x33   : > { %s1454_s7 = smul.u32 96, %s208_s29  ;;  %p1976_p11 = pnand %p1486_p9, %p38_p12 }
  0x34   : > { %s1983_s11 = scalar_lea.hbm %s2093_s0, %s1455_s6  ;;  %s1987_s14 = scalar_lea.sflag [#allocation3], %s208_s29 }
  0x35   : > { %s212_s12 = scalar_lea.vmem [#allocation2], %s1454_s7  ;;  %s1744_s15 = scalar_lea.hbm %s1983_s11, 1536 }
  0x36   : > { %s220_s13 = sshll.u32 %s212_s12, 4  ;;  %p1745_p13 = scmp.ne.s32.totalorder %s1983_s11, %s1744_s15  ;;  %s1985_s13 = int_to_ptr.vmem [resolvable:$true] %s220_s13 }
  0x37   : > { %p1746_p0 = pneg %p1976_p11  ;;  %s1749_s27 = scalar_lea.hbm %s2093_s0, 3072 }
  0x38   : > { %p1750_p1 = scmp.lt.s32.totalorder %s1983_s11, %s2093_s0  ;;  %p1751_p2 = scmp.lt.s32.totalorder %s1749_s27, %s1744_s15 }
  0x39   : > { %p1747_p5 = pnand %p1746_p0, %p1745_p13 }
  0x3a   : > { %p1752_p6 = por %p1751_p2, %p1750_p1 }
  0x3b   : > { %p1748_p10 = pneg %p1747_p5 }
  0x3d   : > { %p1753_p12 = pnand %p1752_p6, %p1748_p10 }
  0x3f   : > { %1756 = shalt.err (!%p1753_p12)
}
  0x40   : > { %s1757_s29 = scalar_lea.vmem %s1985_s13, 1536  ;;  %s1848_s7 = smov [#allocation2]  }
  0x41   : > { %p1758_p3 = scmp.ne.s32.totalorder %s1985_s13, %s1757_s29  ;;  %s1762_s10 = sshll.u32 %s1848_s7, 4  ;;  %s1763_s10 = int_to_ptr.vmem [resolvable:$false] %s1762_s10 }
  0x42   : > { %s1764_s12 = scalar_lea.vmem %s1763_s10, 3072  ;;  %p1765_p5 = scmp.lt.s32.totalorder %s1985_s13, %s1763_s10 }
  0x43   : > { %p1760_p9 = pnand %p1758_p3, %p1746_p0  ;;  %p1766_p7 = scmp.lt.s32.totalorder %s1764_s12, %s1757_s29 }
  0x45   : > { %p1761_p13 = pneg %p1760_p9  ;;  %p1767_p4 = por %p1766_p7, %p1765_p5 }
  0x47   : > { %p1768_p8 = pnand %p1767_p4, %p1761_p13 }
  0x49   : > { %1771 = shalt.err (!%p1768_p8)
}
  0x4a   : > { %s1849_s15 = smov 768   ;;  %s1850_s16 = smov 48  }
  0x4b   : > { %1479 = dma.hbm_to_vmem [thread:$0]  (!%p1976_p11), %s1983_s11, 1536, %s1985_s13, %s1987_s14, %s1849_s15, %s1849_s15, %s1850_s16  }
  0x4c   : > { %p2110_p0 = scmp.ne.s32.totalorder %s2105_s26, 0 }
  0x4d   : > { %s2011_s23 = sand.u32 (!%p2110_p0), 1, %s1832_s19   ;;  %p2111_p4 = scmp.ne.s32.totalorder (!%p2110_p0), %s2103_s24, 0 }
  0x4e   : > { %232 = sbr.rel (%p2110_p0) target bundleno = 639 (0x27f), region = 40  ;;  %s235_s6 = scalar_lea.sflag (!%p2110_p0), [#allocation3], %s2011_s23 }
  0x4f   : > { %s1456_s27 = smul.u32 (!%p2110_p0), 96, %s2011_s23 }
  0x51   : > { %s2015_s9 = scalar_lea.vmem (!%p2110_p0), [#allocation2], %s1456_s27 }
  0x53   : > { %1815 = dma.done.wait (%p2111_p4), %s235_s6, 1536  }
  0x54   : > { %1817 = vsyncadd (%p2111_p4), %s235_s6, 4294965760  ;;  %p2112_p8 = scmp.eq.s32.totalorder %s1905_s22, 0 }
  0x56   : > { %1819 = dma.done.wait (%p2112_p8), [#allocation6], 14336   ;;  %p2113_p7 = pmov %p2112_p8 }
  0x57   : > { %v1532_v0 = vld [vmem:[#allocation5 + $0x74] ss:$8 sps:$4 sm:$0xff]   ;;  %v1534_v1 = vld [vmem:[#allocation5 + $0x70] ss:$8 sps:$4 sm:$0xff]   ;;  %v1538_v4 = vld [vmem:[#allocation5 + $0x64] ss:$8 sps:$4 sm:$0xff]  }
  0x58   : > { %1821 = vsyncadd (%p2113_p7), [#allocation6], 4294952960  ;;  %883 = vmatprep.subr.bf16.mxu0 %v1532_v0  ;;  %v1535_v2 = vld [vmem:[#allocation5 + $0x174] ss:$8 sps:$4 sm:$0xff]   ;;  %v1537_v3 = vld [vmem:[#allocation5 + $0x170] ss:$8 sps:$4 sm:$0xff]  }
  0x59   : > { %884 = vmatpush1.bf16.msra.mxu0 %v1534_v1  ;;  %v1540_v5 = vld [vmem:[#allocation5 + $0x60] ss:$8 sps:$4 sm:$0xff]   ;;  %926 = vmatprep.subr.bf16.mxu1 %v1535_v2  ;;  %v1541_v6 = vld [vmem:[#allocation5 + $0x164] ss:$8 sps:$4 sm:$0xff]   ;;  %v1544_v8 = vld [vmem:[#allocation5 + $0x54] ss:$8 sps:$4 sm:$0xff]  }
  0x5a   : > { %927 = vmatpush1.bf16.msra.mxu1 %v1537_v3  ;;  %885 = vmatprep.subr.bf16.mxu0 %v1538_v4  ;;  %v1543_v7 = vld [vmem:[#allocation5 + $0x160] ss:$8 sps:$4 sm:$0xff]   ;;  %v1546_v9 = vld [vmem:[#allocation5 + $0x50] ss:$8 sps:$4 sm:$0xff]   ;;  %v1547_v10 = vld [vmem:[#allocation5 + $0x154] ss:$8 sps:$4 sm:$0xff]  }
  0x5b   : > { %928 = vmatprep.subr.bf16.mxu1 %v1541_v6  ;;  %v1550_v11 = vld [vmem:[#allocation5 + $0x44] ss:$8 sps:$4 sm:$0xff]   ;;  %v1549_v12 = vld [vmem:[#allocation5 + $0x150] ss:$8 sps:$4 sm:$0xff]   ;;  %v1552_v14 = vld [vmem:[#allocation5 + $0x40] ss:$8 sps:$4 sm:$0xff]  }
  0x5c   : > { %v1553_v13 = vld [vmem:[#allocation5 + $0x144] ss:$8 sps:$4 sm:$0xff]   ;;  %v1556_v15 = vld [vmem:[#allocation5 + $0x34] ss:$8 sps:$4 sm:$0xff]   ;;  %v1555_v16 = vld [vmem:[#allocation5 + $0x140] ss:$8 sps:$4 sm:$0xff]  }
  0x5d   : > { %886 = vmatpush1.bf16.msra.mxu0 %v1540_v5  ;;  %v1559_v17 = vld [vmem:[#allocation5 + $0x134] ss:$8 sps:$4 sm:$0xff]   ;;  %v1558_v18 = vld [vmem:[#allocation5 + $0x30] ss:$8 sps:$4 sm:$0xff]   ;;  %v1562_v19 = vld [vmem:[#allocation5 + $0x24] ss:$8 sps:$4 sm:$0xff]  }
  0x5e   : > { %887 = vmatprep.subr.bf16.mxu0 %v1544_v8  ;;  %929 = vmatpush1.bf16.msra.mxu1 %v1543_v7  ;;  %v1561_v20 = vld [vmem:[#allocation5 + $0x130] ss:$8 sps:$4 sm:$0xff]   ;;  %v1565_v21 = vld [vmem:[#allocation5 + $0x124] ss:$8 sps:$4 sm:$0xff]   ;;  %v1564_v22 = vld [vmem:[#allocation5 + $0x20] ss:$8 sps:$4 sm:$0xff]  }
  0x5f   : > { %930 = vmatprep.subr.bf16.mxu1 %v1547_v10  ;;  %v1568_v23 = vld [vmem:[#allocation5 + $0x14] ss:$8 sps:$4 sm:$0xff]   ;;  %v1567_v24 = vld [vmem:[#allocation5 + $0x120] ss:$8 sps:$4 sm:$0xff]   ;;  %v1570_v26 = vld [vmem:[#allocation5 + $0x10] ss:$8 sps:$4 sm:$0xff]  }
  0x60   : > { %v1571_v25 = vld [vmem:[#allocation5 + $0x114] ss:$8 sps:$4 sm:$0xff]   ;;  %v1574_v27 = vld [vmem:[#allocation5 + $0x4] ss:$8 sps:$4 sm:$0xff]   ;;  %v1573_v28 = vld [vmem:[#allocation5 + $0x110] ss:$8 sps:$4 sm:$0xff]  }
  0x61   : > { %888 = vmatpush1.bf16.msra.mxu0 %v1546_v9  ;;  %v1577_v29 = vld [vmem:[#allocation5 + $0x104] ss:$8 sps:$4 sm:$0xff]   ;;  %v1576_v30 = vld [vmem:[#allocation5] ss:$8 sps:$4 sm:$0xff]   ;;  %v1580_v31 = vld [vmem:[#allocation5 + $0xf4] ss:$8 sps:$4 sm:$0xff]  }
  0x62   : > { %889 = vmatprep.subr.bf16.mxu0 %v1550_v11  ;;  %931 = vmatpush1.bf16.msra.mxu1 %v1549_v12  ;;  %v1579_v32 = vld [vmem:[#allocation5 + $0x100] ss:$8 sps:$4 sm:$0xff]   ;;  %v1583_v33 = vld [vmem:[#allocation5 + $0x1f4] ss:$8 sps:$4 sm:$0xff]   ;;  %v1582_v34 = vld [vmem:[#allocation5 + $0xf0] ss:$8 sps:$4 sm:$0xff]  }
  0x63   : > { %932 = vmatprep.subr.bf16.mxu1 %v1553_v13  ;;  %v1586_v35 = vld [vmem:[#allocation5 + $0xe4] ss:$8 sps:$4 sm:$0xff]   ;;  %v1585_v36 = vld [vmem:[#allocation5 + $0x1f0] ss:$8 sps:$4 sm:$0xff]   ;;  %v1588_v38 = vld [vmem:[#allocation5 + $0xe0] ss:$8 sps:$4 sm:$0xff]  }
  0x64   : > { %v1589_v37 = vld [vmem:[#allocation5 + $0x1e4] ss:$8 sps:$4 sm:$0xff]   ;;  %v1592_v39 = vld [vmem:[#allocation5 + $0xd4] ss:$8 sps:$4 sm:$0xff]   ;;  %v1591_v40 = vld [vmem:[#allocation5 + $0x1e0] ss:$8 sps:$4 sm:$0xff]  }
  0x65   : > { %890 = vmatpush1.bf16.msra.mxu0 %v1552_v14  ;;  %v1595_v41 = vld [vmem:[#allocation5 + $0x1d4] ss:$8 sps:$4 sm:$0xff]   ;;  %v1594_v42 = vld [vmem:[#allocation5 + $0xd0] ss:$8 sps:$4 sm:$0xff]   ;;  %v1598_v43 = vld [vmem:[#allocation5 + $0xc4] ss:$8 sps:$4 sm:$0xff]  }
  0x66   : > { %891 = vmatprep.subr.bf16.mxu0 %v1556_v15  ;;  %933 = vmatpush1.bf16.msra.mxu1 %v1555_v16  ;;  %v1597_v44 = vld [vmem:[#allocation5 + $0x1d0] ss:$8 sps:$4 sm:$0xff]   ;;  %v1601_v45 = vld [vmem:[#allocation5 + $0x1c4] ss:$8 sps:$4 sm:$0xff]   ;;  %v1600_v48 = vld [vmem:[#allocation5 + $0xc0] ss:$8 sps:$4 sm:$0xff]  }
  0x67   : > { %934 = vmatprep.subr.bf16.mxu1 %v1559_v17  ;;  %v279_v46 = vld [vmem:[%s2015_s9 + $0x8] sm:$0xff]  ;;  %v285_v47 = vld [vmem:[%s2015_s9 + $0x38] sm:$0xff]  ;;  %v278_v5 = vld [vmem:[%s2015_s9] sm:$0xff]  ;;  %s1312_s8 = sshll.u32 %s2011_s23, 4  ;;  %s1431_s7 = sshll.u32 %s1905_s22, 8 }
  0x68   : > { %v291_v49 = vpack.c.bf16 %v285_v47, %v279_v46  ;;  %v1604_v50 = vld [vmem:[#allocation5 + $0xb4] ss:$8 sps:$4 sm:$0xff]   ;;  %v1603_v51 = vld [vmem:[#allocation5 + $0x1c0] ss:$8 sps:$4 sm:$0xff]   ;;  %v1606_v56 = vld [vmem:[#allocation5 + $0xb0] ss:$8 sps:$4 sm:$0xff]   ;;  %s2050_s15 = scalar_lea.hbm %s2098_s5, %s1431_s7 }
  0x69   : > { %892 = vmatpush1.bf16.msra.mxu0 %v1558_v18  ;;  %v281_v52 = vld [vmem:[%s2015_s9 + $0x18] sm:$0xff]  ;;  %v287_v53 = vld [vmem:[%s2015_s9 + $0x48] sm:$0xff]  ;;  %v284_v7 = vld [vmem:[%s2015_s9 + $0x30] sm:$0xff]  ;;  %s272_s14 = scalar_lea.vmem [#allocation8], %s1312_s8  ;;  %s1196_s16 = scalar_lea.sflag [#allocation4], %s2011_s23 }
  0x6a   : > { %893 = vmatprep.subr.bf16.mxu0 %v1562_v19  ;;  %935 = vmatpush1.bf16.msra.mxu1 %v1561_v20  ;;  %v1607_v54 = vld [vmem:[#allocation5 + $0x1b4] ss:$8 sps:$4 sm:$0xff]   ;;  %v293_v55 = vpack.c.bf16 %v287_v53, %v281_v52  ;;  %v1610_v57 = vld [vmem:[#allocation5 + $0xa4] ss:$8 sps:$4 sm:$0xff]   ;;  %v1609_v58 = vld [vmem:[#allocation5 + $0x1b0] ss:$8 sps:$4 sm:$0xff]   ;;  %v290_v11 = vpack.c.bf16 %v284_v7, %v278_v5 }
  0x6b   : > { %936 = vmatprep.subr.bf16.mxu1 %v1565_v21  ;;  %915 = vmatprep.mubr.bf16.mxu0 %v291_v49  ;;  %v1613_v59 = vld [vmem:[#allocation5 + $0x1a4] ss:$8 sps:$4 sm:$0xff]   ;;  %v1612_v60 = vld [vmem:[#allocation5 + $0xa0] ss:$8 sps:$4 sm:$0xff]   ;;  %v1616_v61 = vld [vmem:[#allocation5 + $0x94] ss:$8 sps:$4 sm:$0xff]  }
  0x6c   : > { %958 = vmatprep.mubr.bf16.mxu1 %v293_v55  ;;  %v1615_v62 = vld [vmem:[#allocation5 + $0x1a0] ss:$8 sps:$4 sm:$0xff]   ;;  %v1619_v63 = vld [vmem:[#allocation5 + $0x194] ss:$8 sps:$4 sm:$0xff]   ;;  %v1618_v0 = vld [vmem:[#allocation5 + $0x90] ss:$8 sps:$4 sm:$0xff]  }
  0x6d   : > { %894 = vmatpush1.bf16.msra.mxu0 %v1564_v22  ;;  %v1621_v1 = vld [vmem:[#allocation5 + $0x190] ss:$8 sps:$4 sm:$0xff]   ;;  %v1622_v2 = vld [vmem:[#allocation5 + $0x84] ss:$8 sps:$4 sm:$0xff]   ;;  %v1624_v3 = vld [vmem:[#allocation5 + $0x80] ss:$8 sps:$4 sm:$0xff]  }
  0x6e   : > { %895 = vmatprep.subr.bf16.mxu0 %v1568_v23  ;;  %937 = vmatpush1.bf16.msra.mxu1 %v1567_v24  ;;  %v1625_v4 = vld [vmem:[#allocation5 + $0x184] ss:$8 sps:$4 sm:$0xff]   ;;  %v1627_v6 = vld [vmem:[#allocation5 + $0x180] ss:$8 sps:$4 sm:$0xff]   ;;  %v1630_v8 = vld [vmem:[#allocation5 + $0x274] ss:$8 sps:$4 sm:$0xff]  }
  0x6f   : > { %938 = vmatprep.subr.bf16.mxu1 %v1571_v25  ;;  %v280_v9 = vld [vmem:[%s2015_s9 + $0x10] sm:$0xff]  ;;  %v286_v10 = vld [vmem:[%s2015_s9 + $0x40] sm:$0xff]  ;;  %v283_v15 = vld [vmem:[%s2015_s9 + $0x28] sm:$0xff]  ;;  %s1209_s29 = sshll.u32 %s272_s14, 4  ;;  %p2114_p10 = scmp.ne.s32.totalorder %s2108_s30, 0  ;;  %s2045_s29 = int_to_ptr.vmem [resolvable:$true] %s1209_s29 }
  0x70   : > { %v1628_v12 = vld [vmem:[#allocation5 + $0x270] ss:$8 sps:$4 sm:$0xff]   ;;  %v292_v13 = vpack.c.bf16 %v286_v10, %v280_v9  ;;  %v1633_v14 = vld [vmem:[#allocation5 + $0x264] ss:$8 sps:$4 sm:$0xff]   ;;  %v1631_v16 = vld [vmem:[#allocation5 + $0x260] ss:$8 sps:$4 sm:$0xff]  }
  0x71   : > { %896 = vmatpush1.bf16.msra.mxu0 %v1570_v26  ;;  %v289_v17 = vld [vmem:[%s2015_s9 + $0x58] sm:$0xff]  ;;  %v1639_v21 = vld [vmem:[#allocation5 + $0x244] ss:$8 sps:$4 sm:$0xff]   ;;  %v1637_v22 = vld [vmem:[#allocation5 + $0x240] ss:$8 sps:$4 sm:$0xff]   ;;  %s1772_s27 = scalar_lea.vmem %s2045_s29, 256 }
  0x72   : > { %897 = vmatprep.subr.bf16.mxu0 %v1574_v27  ;;  %939 = vmatpush1.bf16.msra.mxu1 %v1573_v28  ;;  %v1636_v18 = vld [vmem:[#allocation5 + $0x254] ss:$8 sps:$4 sm:$0xff]   ;;  %v295_v19 = vpack.c.bf16 %v289_v17, %v283_v15  ;;  %v1634_v20 = vld [vmem:[#allocation5 + $0x250] ss:$8 sps:$4 sm:$0xff]   ;;  %v1645_v25 = vld [vmem:[#allocation5 + $0x224] ss:$8 sps:$4 sm:$0xff]   ;;  %p1773_p11 = scmp.ne.s32.totalorder %s2045_s29, %s1772_s27 }
  0x73   : > { %940 = vmatprep.subr.bf16.mxu1 %v1577_v29  ;;  %v1642_v23 = vld [vmem:[#allocation5 + $0x234] ss:$8 sps:$4 sm:$0xff]   ;;  %v1640_v24 = vld [vmem:[#allocation5 + $0x230] ss:$8 sps:$4 sm:$0xff]   ;;  %v1643_v26 = vld [vmem:[#allocation5 + $0x220] ss:$8 sps:$4 sm:$0xff]  }
  0x74   : > { %v1648_v27 = vld [vmem:[#allocation5 + $0x214] ss:$8 sps:$4 sm:$0xff]   ;;  %v1646_v28 = vld [vmem:[#allocation5 + $0x210] ss:$8 sps:$4 sm:$0xff]   ;;  %v1651_v29 = vld [vmem:[#allocation5 + $0x204] ss:$8 sps:$4 sm:$0xff]   ;;  %p1774_p1 = pnand %p1773_p11, %p2114_p10 }
  0x75   : > { %898 = vmatpush1.bf16.msra.mxu0 %v1576_v30  ;;  %v1649_v30 = vld [vmem:[#allocation5 + $0x200] ss:$8 sps:$4 sm:$0xff]   ;;  %v1678_v52 = vld [vmem:[#allocation7 + $0x70] sm:$0xff]   ;;  %s1851_s22 = smov [#allocation8]  }
  0x76   : > { %899 = vmatprep.subr.bf16.mxu0 %v1580_v31  ;;  %941 = vmatpush1.bf16.msra.mxu1 %v1579_v32  ;;  %v1654_v31 = vld [vmem:[#allocation5 + $0x2f4] ss:$8 sps:$4 sm:$0xff]   ;;  %v1652_v32 = vld [vmem:[#allocation5 + $0x2f0] ss:$8 sps:$4 sm:$0xff]   ;;  %v1673_v46 = vld [vmem:[#allocation5 + $0x280] ss:$8 sps:$4 sm:$0xff]   ;;  %p1775_p2 = pneg %p1774_p1 }
  0x77   : > { %942 = vmatprep.subr.bf16.mxu1 %v1583_v33  ;;  %v1657_v33 = vld [vmem:[#allocation5 + $0x2e4] ss:$8 sps:$4 sm:$0xff]   ;;  %v1679_v53 = vld [vmem:[#allocation7 + $0x30] sm:$0xff]   ;;  %s1776_s6 = sshll.u32 %s1851_s22, 4  ;;  %s1777_s6 = int_to_ptr.vmem [resolvable:$false] %s1776_s6 }
  0x78   : > { %v282_v47 = vld [vmem:[%s2015_s9 + $0x20] sm:$0xff]  ;;  %v1681_v55 = vld [vmem:[#allocation7 + $0x28] sm:$0xff]   ;;  %p1779_p6 = scmp.lt.s32.totalorder %s2045_s29, %s1777_s6 }
  0x79   : > { %900 = vmatpush2.bf16.msra.mxu0 %v1582_v34  ;;  %v1655_v34 = vld [vmem:[#allocation5 + $0x2e0] ss:$8 sps:$4 sm:$0xff]  }
  0x7a   : > { %901 = vmatprep.subr.bf16.mxu0 %v1586_v35  ;;  %943 = vmatpush2.bf16.msra.mxu1 %v1585_v36  ;;  %v1660_v35 = vld [vmem:[#allocation5 + $0x2d4] ss:$8 sps:$4 sm:$0xff]   ;;  %v1658_v36 = vld [vmem:[#allocation5 + $0x2d0] ss:$8 sps:$4 sm:$0xff]  }
  0x7b   : > { %944 = vmatprep.subr.bf16.mxu1 %v1589_v37  ;;  %v1663_v37 = vld [vmem:[#allocation5 + $0x2c4] ss:$8 sps:$4 sm:$0xff]  }
  0x7d   : > { %902 = vmatpush2.bf16.msra.mxu0 %v1588_v38  ;;  %v1661_v38 = vld [vmem:[#allocation5 + $0x2c0] ss:$8 sps:$4 sm:$0xff]  }
  0x7e   : > { %903 = vmatprep.subr.bf16.mxu0 %v1592_v39  ;;  %945 = vmatpush2.bf16.msra.mxu1 %v1591_v40  ;;  %v1666_v39 = vld [vmem:[#allocation5 + $0x2b4] ss:$8 sps:$4 sm:$0xff]   ;;  %v1664_v40 = vld [vmem:[#allocation5 + $0x2b0] ss:$8 sps:$4 sm:$0xff]  }
  0x7f   : > { %946 = vmatprep.subr.bf16.mxu1 %v1595_v41  ;;  %v1669_v41 = vld [vmem:[#allocation5 + $0x2a4] ss:$8 sps:$4 sm:$0xff]  }
  0x81   : > { %904 = vmatpush2.bf16.msra.mxu0 %v1594_v42  ;;  %v1667_v42 = vld [vmem:[#allocation5 + $0x2a0] ss:$8 sps:$4 sm:$0xff]  }
  0x82   : > { %905 = vmatprep.subr.bf16.mxu0 %v1598_v43  ;;  %947 = vmatpush2.bf16.msra.mxu1 %v1597_v44  ;;  %v1672_v43 = vld [vmem:[#allocation5 + $0x294] ss:$8 sps:$4 sm:$0xff]   ;;  %v1670_v44 = vld [vmem:[#allocation5 + $0x290] ss:$8 sps:$4 sm:$0xff]  }
  0x83   : > { %948 = vmatprep.subr.bf16.mxu1 %v1601_v45  ;;  %v1675_v45 = vld [vmem:[#allocation5 + $0x284] ss:$8 sps:$4 sm:$0xff]  }
  0x85   : > { %906 = vmatpush2.bf16.msra.mxu0 %v1600_v48  ;;  %v288_v48 = vld [vmem:[%s2015_s9 + $0x50] sm:$0xff]  ;;  %s1778_s9 = scalar_lea.vmem %s1777_s6, 512 }
  0x86   : > { %907 = vmatprep.subr.bf16.mxu0 %v1604_v50  ;;  %949 = vmatpush2.bf16.msra.mxu1 %v1603_v51  ;;  %v294_v49 = vpack.c.bf16 %v288_v48, %v282_v47  ;;  %v1676_v50 = vld [vmem:[#allocation7 + $0x78] sm:$0xff]   ;;  %p1780_p12 = scmp.lt.s32.totalorder %s1778_s9, %s1772_s27 }
  0x87   : > { %950 = vmatprep.subr.bf16.mxu1 %v1607_v54  ;;  %v1677_v51 = vld [vmem:[#allocation7 + $0x38] sm:$0xff]   ;;  %v1680_v54 = vld [vmem:[#allocation7 + $0x68] sm:$0xff]  }
  0x88   : > { %p1781_p3 = por %p1780_p12, %p1779_p6 }
  0x89   : > { %908 = vmatpush2.bf16.msra.mxu0 %v1606_v56  ;;  %v1682_v56 = vld [vmem:[#allocation7 + $0x60] sm:$0xff]  }
  0x8a   : > { %909 = vmatprep.subr.bf16.mxu0 %v1610_v57  ;;  %951 = vmatpush2.bf16.msra.mxu1 %v1609_v58  ;;  %v1683_v57 = vld [vmem:[#allocation7 + $0x20] sm:$0xff]   ;;  %v1684_v58 = vld [vmem:[#allocation7 + $0x58] sm:$0xff]   ;;  %p1782_p9 = pnand %p1781_p3, %p1775_p2 }
  0x8b   : > { %952 = vmatprep.subr.bf16.mxu1 %v1613_v59  ;;  %v1685_v59 = vld [vmem:[#allocation7 + $0x18] sm:$0xff]  }
  0x8d   : > { %910 = vmatpush2.bf16.msra.mxu0 %v1612_v60  ;;  %v1686_v60 = vld [vmem:[#allocation7 + $0x50] sm:$0xff]  }
  0x8e   : > { %911 = vmatprep.subr.bf16.mxu0 %v1616_v61  ;;  %953 = vmatpush2.bf16.msra.mxu1 %v1615_v62  ;;  %v1687_v61 = vld [vmem:[#allocation7 + $0x10] sm:$0xff]   ;;  %v1688_v62 = vld [vmem:[#allocation7 + $0x48] sm:$0xff]  }
  0x8f   : > { %954 = vmatprep.subr.bf16.mxu1 %v1619_v63  ;;  %v1689_v63 = vld [vmem:[#allocation7 + $0x8] sm:$0xff]  }
  0x91   : > { %912 = vmatpush2.bf16.msra.mxu0 %v1618_v0  ;;  %v1690_v0 = vld [vmem:[#allocation7 + $0x40] sm:$0xff]  }
  0x92   : > { %913 = vmatprep.subr.bf16.mxu0 %v1622_v2  ;;  %955 = vmatpush2.bf16.msra.mxu1 %v1621_v1  ;;  %v1691_v1 = vld [vmem:[#allocation7] sm:$0xff]   ;;  %v393_v2 = vlaneseq }
  0x93   : > { %956 = vmatprep.subr.bf16.mxu1 %v1625_v4 }
  0x94   : > { %v394_v4 = vshrl.u32 %v393_v2, 7 }
  0x95   : > { %914 = vmatpush2.bf16.msra.mxu0 %v1624_v3 }
  0x96   : > { %969 = vmatprep.subr.bf16.mxu0 %v1630_v8  ;;  %957 = vmatpush2.bf16.msra.mxu1 %v1627_v6  ;;  %v399_v7 = vsub.s32 1, %v394_v4  ;;  %v276_v8 = vld [vmem:[%s2095_s2] sm:$0x3]  ;;  %v395_v9 = vsub.s32 0, %v394_v4 }
  0x97   : > { %1432 = vmatprep.subr.bf16.mxu1 %v1676_v50 }
  0x98   : > { %916 = vmatmul.mubr.bf16.vlgmr.msra.gmra.mxu0 %v290_v11 }
  0x99   : > { %970 = vmatpush1.bf16.msra.mxu0 %v1628_v12  ;;  %959 = vmatmul.mubr.bf16.vlgmr.msra.gmra.mxu1 %v292_v13  ;;  %v400_v12 = vrot.slane %v276_v8, %v399_v7  ;;  %v396_v13 = vrot.slane %v276_v8, %v395_v9 }
  0x9a   : > { %971 = vmatprep.subr.bf16.mxu0 %v1633_v14  ;;  %1001 = vmatprep.mubr.bf16.mxu0 %v295_v19 }
  0x9b   : > { %1433 = vmatpush3.bf16.msra.mxu1 %v1677_v51 }
  0x9c   : > { %1434 = vmatprep.subr.bf16.mxu1 %v1678_v52 }
  0x9d   : > { %972 = vmatpush1.bf16.msra.mxu0 %v1631_v16 }
  0x9e   : > { %973 = vmatprep.subr.bf16.mxu0 %v1636_v18 }
  0x9f   : > { %1435 = vmatpush3.bf16.msra.mxu1 %v1679_v53 }
  0xa0   : > { %1436 = vmatprep.subr.bf16.mxu1 %v1680_v54 }
  0xa1   : > { %974 = vmatpush1.bf16.msra.mxu0 %v1634_v20 }
  0xa2   : > { %975 = vmatprep.subr.bf16.mxu0 %v1639_v21 }
  0xa3   : > { %1437 = vmatpush3.bf16.msra.mxu1 %v1681_v55 }
  0xa4   : > { %1438 = vmatprep.subr.bf16.mxu1 %v1682_v56 }
  0xa5   : > { %976 = vmatpush1.bf16.msra.mxu0 %v1637_v22 }
  0xa6   : > { %977 = vmatprep.subr.bf16.mxu0 %v1642_v23 }
  0xa7   : > { %1439 = vmatpush3.bf16.msra.mxu1 %v1683_v57 }
  0xa8   : > { %1440 = vmatprep.subr.bf16.mxu1 %v1684_v58 }
  0xa9   : > { %978 = vmatpush1.bf16.msra.mxu0 %v1640_v24 }
  0xaa   : > { %979 = vmatprep.subr.bf16.mxu0 %v1645_v25 }
  0xab   : > { %1441 = vmatpush3.bf16.msra.mxu1 %v1685_v59 }
  0xac   : > { %1442 = vmatprep.subr.bf16.mxu1 %v1686_v60 }
  0xad   : > { %980 = vmatpush1.bf16.msra.mxu0 %v1643_v26 }
  0xae   : > { %981 = vmatprep.subr.bf16.mxu0 %v1648_v27 }
  0xaf   : > { %1443 = vmatpush3.bf16.msra.mxu1 %v1687_v61 }
  0xb0   : > { %1444 = vmatprep.subr.bf16.mxu1 %v1688_v62 }
  0xb1   : > { %982 = vmatpush1.bf16.msra.mxu0 %v1646_v28 }
  0xb2   : > { %983 = vmatprep.subr.bf16.mxu0 %v1651_v29 }
  0xb3   : > { %1445 = vmatpush3.bf16.msra.mxu1 %v1689_v63 }
  0xb4   : > { %1446 = vmatprep.subr.bf16.mxu1 %v1690_v0 }
  0xb5   : > { %984 = vmatpush1.bf16.msra.mxu0 %v1649_v30 }
  0xb6   : > { %985 = vmatprep.subr.bf16.mxu0 %v1654_v31 }
  0xb7   : > { %1447 = vmatpush3.bf16.msra.mxu1 %v1691_v1 }
  0xb9   : > { %986 = vmatpush2.bf16.msra.mxu0 %v1652_v32 }
  0xba   : > { %987 = vmatprep.subr.bf16.mxu0 %v1657_v33 }
  0xbd   : > { %988 = vmatpush2.bf16.msra.mxu0 %v1655_v34 }
  0xbe   : > { %989 = vmatprep.subr.bf16.mxu0 %v1660_v35 }
  0xc1   : > { %990 = vmatpush2.bf16.msra.mxu0 %v1658_v36 }
  0xc2   : > { %991 = vmatprep.subr.bf16.mxu0 %v1663_v37 }
  0xc5   : > { %992 = vmatpush2.bf16.msra.mxu0 %v1661_v38 }
  0xc6   : > { %993 = vmatprep.subr.bf16.mxu0 %v1666_v39 }
  0xc9   : > { %994 = vmatpush2.bf16.msra.mxu0 %v1664_v40  ;;  %v1409_v40 = vld [vmem:[%s2097_s4] ss:$0 sm:$0xff] }
  0xca   : > { %995 = vmatprep.subr.bf16.mxu0 %v1669_v41 }
  0xcd   : > { %996 = vmatpush2.bf16.msra.mxu0 %v1667_v42 }
  0xce   : > { %997 = vmatprep.subr.bf16.mxu0 %v1672_v43 }
  0xd1   : > { %998 = vmatpush2.bf16.msra.mxu0 %v1670_v44 }
  0xd2   : > { %999 = vmatprep.subr.bf16.mxu0 %v1675_v45 }
  0xd5   : > { %1000 = vmatpush2.bf16.msra.mxu0 %v1673_v46 }
  0xd8   : > { %1002 = vmatmul.mubr.bf16.vlgmr.msra.gmra.mxu0 %v294_v49 }
 0x158   : > { %v917_v3 = vpop.f32.mrf.mxu0 }
 0x159   : > { %v960_v6 = vpop.f32.mrf.mxu1  ;;  %v918_v18 = vadd.f32 %v917_v3, %v396_v13 }
 0x15a   : > { %v919_v5 = vpop.f32.mrf.mxu0 }
 0x15b   : > { %v962_v11 = vpop.f32.mrf.mxu1  ;;  %v920_v16 = vadd.f32 %v919_v5, %v400_v12  ;;  %v961_v25 = vadd.f32 %v960_v6, %v918_v18 }
 0x15c   : > { %v921_v10 = vpop.f32.mrf.mxu0 }
 0x15d   : > { %v964_v15 = vpop.f32.mrf.mxu1  ;;  %v922_v17 = vadd.f32 %v921_v10, %v396_v13  ;;  %v963_v23 = vadd.f32 %v962_v11, %v920_v16 }
 0x15e   : > { %v923_v14 = vpop.f32.mrf.mxu0 }
 0x15f   : > { %v924_v20 = vadd.f32 %v923_v14, %v400_v12  ;;  %v966_v21 = vpop.f32.mrf.mxu1  ;;  %v965_v24 = vadd.f32 %v964_v15, %v922_v17 }
 0x161   : > { %v967_v27 = vadd.f32 %v966_v21, %v924_v20 }
 0x198   : > { %v1003_v19 = vpop.f32.mrf.mxu0 }
 0x199   : > { %v1004_v30 = vadd.f32 %v1003_v19, %v961_v25 }
 0x19a   : > { %v1005_v22 = vpop.f32.mrf.mxu0 }
 0x19b   : > { %v1006_v28 = vadd.f32 %v1005_v22, %v963_v23  ;;  %v1012_v36 = vmax.f32 %v1004_v30, 0.0 }
 0x19c   : > { %v1007_v26 = vpop.f32.mrf.mxu0 }
 0x19d   : > { %v1008_v29 = vadd.f32 %v1007_v26, %v965_v24  ;;  %v1013_v34 = vmax.f32 %v1006_v28, 0.0 }
 0x19e   : > { %v1009_v31 = vpop.f32.mrf.mxu0 }
 0x19f   : > { %v1010_v32 = vadd.f32 %v1009_v31, %v967_v27  ;;  %v1014_v33 = vmax.f32 %v1008_v29, 0.0 }
 0x1a1   : > { %v1015_v35 = vmax.f32 %v1010_v32, 0.0  ;;  %v1016_v38 = vpack.c.bf16 %v1014_v33, %v1012_v36 }
 0x1a3   : > { %v1017_v37 = vpack.c.bf16 %v1015_v35, %v1013_v34 }
 0x1a5   : > { %1184 = vmatprep.mubr.bf16.mxu1 %v1017_v37 }
 0x1a6   : > { %1185 = vmatmul.mubr.bf16.vlgmr.msra.gmra.mxu1 %v1016_v38 }
 0x266   : > { %v1448_v39 = vpop.f32.mrf.mxu1 }
 0x268   : > { %v1449_v41 = vpop.f32.mrf.mxu1 }
 0x269   : > { %v1450_v42 = vadd.f32 %v1449_v41, %v1448_v39 }
 0x26a   : > { %v1451_v43 = vpop.f32.mrf.mxu1 }
 0x26b   : > { %v1187_v44 = vadd.f32 %v1450_v42, %v1409_v40 }
 0x26c   : > { %v1452_v45 = vpop.f32.mrf.mxu1 }
 0x26d   : > { %1193 = vst [vmem:[%s272_s14] sm:$0xff] %v1187_v44  ;;  %v1453_v46 = vadd.f32 %v1452_v45, %v1451_v43 }
 0x26f   : > { %v1190_v47 = vadd.f32 %v1453_v46, %v1409_v40 }
 0x271   : > { %1194 = vst [vmem:[%s272_s14 + $0x8] sm:$0xff] %v1190_v47 }
 0x272   : > { %1785 = shalt.err (!%p1782_p9)
}
 0x273   : > { %s1786_s24 = scalar_lea.hbm %s2050_s15, 256  ;;  %s1790_s11 = scalar_lea.hbm %s2098_s5, 512 }
 0x274   : > { %p1787_p13 = scmp.ne.s32.totalorder %s2050_s15, %s1786_s24  ;;  %p1791_p4 = scmp.lt.s32.totalorder %s2050_s15, %s2098_s5 }
 0x275   : > { %p1792_p8 = scmp.lt.s32.totalorder %s1790_s11, %s1786_s24 }
 0x276   : > { %p1788_p5 = pnand %p1787_p13, %p2114_p10 }
 0x277   : > { %p1793_p7 = por %p1792_p8, %p1791_p4 }
 0x278   : > { %p1789_p0 = pneg %p1788_p5 }
 0x27a   : > { %p1794_p11 = pnand %p1793_p7, %p1789_p0 }
 0x27c   : > { %1797 = shalt.err (!%p1794_p11)
}
 0x27d   : > { %s1852_s7 = smov 128   ;;  %s1853_s10 = smov 8  }
 0x27e   : > { %1467 = dma.vmem_to_hbm [thread:$0]  (%p2114_p10), %s2045_s29, 256, %s2050_s15, %s1196_s16, %s1852_s7, %s1852_s7, %s1853_s10  }
 0x27f PF: > { %s1224_s12 = sand.u32 1, %s1828_s18   ;;  %p2115_p1 = scmp.ne.s32.totalorder %s2104_s25, 0 }
 0x280   : > { %p2116_p2 = scmp.ge.s32.totalorder %s1840_s21, 2  ;;  %s1225_s27 = scalar_lea.sflag [#allocation4], %s1224_s12 }
 0x282   : > { %p1481_p6 = pnand %p2116_p2, %p2115_p1 }
 0x284   : > { %p1482_p12 = pneg %p1481_p6 }
 0x286   : > { %1823 = dma.done.wait (%p1482_p12), %s1225_s27, 256  }
 0x287   : > { %1825 = vsyncadd (%p1482_p12), %s1225_s27, 4294967040  ;;  %p19_p3 = scmp.ge.s32.totalorder %s1956_s17, 4   ;;  %s2117_s18 = smov %s1832_s19 }
 0x288   : > { %s2118_s19 = smov %s1836_s20  ;;  %s2119_s20 = smov %s1965_s28 }
 0x289   : > { %s2120_s21 = smov %s1956_s17  ;;  %21 = sbr.rel (!%p19_p3) target bundleno = 6 (0x6), region = 93 }
 0x28e   :  { %1230 = vsyncpa [#allocation3], 1 }
 0x28f   :  { %1232 = vsyncpa [#allocation3 + $0x1], 1 }
 0x290   :  { %1233 = vsyncpa [#allocation6], 1 }
 0x291   :  { %1234 = vsyncpa [#allocation4], 1 }
 0x292   :  { %1236 = vsyncpa [#allocation4 + $0x1], 1 }

</bundles_post_ra>
